<compile_context>
chip_gen: v7x
topology: tpu7x:2x2x1
jax: 0.10.0
libtpu: 0.0.40
codegen_flags: <defaults>
</compile_context>

<pallas_src>
import jax
import jax.numpy as jnp
from jax.experimental import pallas as pl
from jax.experimental.pallas import tpu as pltpu


def mlp_kernel(x_ref, w1_ref, b1_ref, w2_ref, b2_ref, o_ref):
    # fc1 + ReLU on the MXU, accumulating in f32.
    h = jnp.dot(x_ref[...], w1_ref[...], preferred_element_type=jnp.float32)
    h = jnp.maximum(h + b1_ref[...].astype(jnp.float32), 0.0)   # (TM,4)+(1,4)

    # fc2 (K = 4) also on the MXU; hidden under the x-load / out-store DMA.
    y = jnp.dot(h, w2_ref[...].astype(jnp.float32),
                preferred_element_type=jnp.float32)
    y = y + b2_ref[...].astype(jnp.float32)                     # (TM,out)+(1,out)

    o_ref[...] = y.astype(o_ref.dtype)


def _ceil_to(x, m):
    return ((x + m - 1) // m) * m


def _pick_row_tile(B, insize, hidden, outsize, dtype, vmem_budget):
    """Byte-based, lane-padding- and dtype-aware row-tile selection."""
    itemsize = jnp.dtype(dtype).itemsize
    sub = max(8, 32 // itemsize)          # sublane packing: f32=8, bf16=16, i8=32
    lanes_in = _ceil_to(insize, 128)      # VMEM tiles pad the last dim to 128
    lanes_out = _ceil_to(outsize, 128)
    lanes_hid = _ceil_to(hidden, 128)

    # Resident (but still double-buffered) weight/bias footprint.
    weight_bytes = 2 * itemsize * (
        _ceil_to(insize, sub) * lanes_hid      # w1
        + _ceil_to(hidden, sub) * lanes_out    # w2
        + sub * lanes_hid                      # b1
        + sub * lanes_out)                     # b2

    per_row = 2 * (lanes_in + lanes_out) * itemsize   # double-buffered x + out
    budget = max(vmem_budget - weight_bytes - (1 << 20), per_row * sub)
    tm = budget // per_row

    # Target several MiB of x per buffer: big enough to amortize the ~0.35us
    # per-grid-step overhead, small enough to leave VMEM headroom.
    target_x_bytes = 8 << 20
    tm = min(tm, max(sub, target_x_bytes // (lanes_in * itemsize)))

    # For large batches keep >= 2-4 grid steps so "parallel" can shard the
    # grid across both v7x TensorCores and the pipeline has steps to overlap.
    min_split_rows = 1024
    if B >= 4 * min_split_rows:
        tm = min(tm, _ceil_to(pl.cdiv(B, 4), sub))
    elif B >= 2 * min_split_rows:
        tm = min(tm, _ceil_to(pl.cdiv(B, 2), sub))

    tm = min(tm, _ceil_to(B, sub))        # never bigger than the (padded) batch
    tm = max(sub, (tm // sub) * sub)      # sublane-aligned
    return int(tm)


def mlp_forward(x, w1, b1, w2, b2, *, tile_rows=None):
    B, insize = x.shape
    hidden = w1.shape[1]                  # = 4
    outsize = w2.shape[1]

    # Generation-aware VMEM budget (v7x: 64 MiB physical -> ~32 MiB; v5e/v6e:
    # 128 MiB physical -> 48 MiB), passed explicitly as the scoped limit.
    try:
        vmem_cap = int(pltpu.get_tpu_info().vmem_capacity_bytes)
    except Exception:
        vmem_cap = 64 << 20               # conservative fallback (v7x physical)
    vmem_budget = min(vmem_cap // 2, 48 << 20)

    tm = tile_rows if tile_rows is not None else _pick_row_tile(
        B, insize, hidden, outsize, x.dtype, vmem_budget)
    num_tiles = pl.cdiv(B, tm)            # ragged last block handled by Pallas

    itemsize = jnp.dtype(x.dtype).itemsize
    cost = pl.CostEstimate(
        flops=2 * B * insize * hidden + 2 * B * hidden * outsize,
        transcendentals=0,
        bytes_accessed=(B * (insize + outsize)
                        + insize * hidden + hidden * outsize
                        + hidden + outsize) * itemsize)

    return pl.pallas_call(
        mlp_kernel,
        out_shape=jax.ShapeDtypeStruct((B, outsize), x.dtype),
        grid=(num_tiles,),
        in_specs=[
            pl.BlockSpec((tm, insize), lambda i: (i, 0)),        # x: row-tiled
            pl.BlockSpec((insize, hidden), lambda i: (0, 0)),    # w1: resident
            pl.BlockSpec((1, hidden), lambda i: (0, 0)),         # b1: resident
            pl.BlockSpec((hidden, outsize), lambda i: (0, 0)),   # w2: resident
            pl.BlockSpec((1, outsize), lambda i: (0, 0)),        # b2: resident
        ],
        out_specs=pl.BlockSpec((tm, outsize), lambda i: (i, 0)),
        compiler_params=pltpu.CompilerParams(
            dimension_semantics=("parallel",),   # independent row tiles
            vmem_limit_bytes=int(vmem_budget)),
        cost_estimate=cost,
    )(x, w1, b1, w2, b2)


if __name__ == "__main__":
    # Small, deterministic synthetic setup consistent with M(insize, outsize).
    insize, outsize = 32, 8
    hidden = 4
    batch = 16

    key = jax.random.PRNGKey(0)
    kx, kw1, kb1, kw2, kb2 = jax.random.split(key, 5)

    x = jax.random.normal(kx, (batch, insize), dtype=jnp.float32)

    # Deterministic parameter init (PyTorch-style uniform bounds, fixed seed).
    bound1 = 1.0 / (insize ** 0.5)
    w1 = jax.random.uniform(kw1, (insize, hidden), jnp.float32, -bound1, bound1)
    b1 = jax.random.uniform(kb1, (1, hidden), jnp.float32, -bound1, bound1)

    bound2 = 1.0 / (hidden ** 0.5)
    w2 = jax.random.uniform(kw2, (hidden, outsize), jnp.float32, -bound2, bound2)
    b2 = jax.random.uniform(kb2, (1, outsize), jnp.float32, -bound2, bound2)

    def ref_fn(xa):
        return jnp.maximum(xa @ w1 + b1, 0.0) @ w2 + b2

    # 1) Small batch, single tile.
    out = mlp_forward(x, w1, b1, w2, b2)
    jax.block_until_ready(out)
    assert out.shape == (batch, outsize)
    assert jnp.allclose(out, ref_fn(x), atol=1e-5, rtol=1e-5)

    # 2) Ragged batch (no wrapper pad/slice): grid of 4 with a partial last
    #    block whose out-of-range rows are masked on store.
    batch2 = 50
    x2 = jax.random.normal(jax.random.PRNGKey(1), (batch2, insize), jnp.float32)
    out2 = mlp_forward(x2, w1, b1, w2, b2, tile_rows=16)
    jax.block_until_ready(out2)
    assert out2.shape == (batch2, outsize)
    assert jnp.allclose(out2, ref_fn(x2), atol=1e-5, rtol=1e-5)

    print("KERNEL_OK")
</pallas_src>

<mosaic_0001>
module attributes {stable_mosaic.version = 11 : i64} {
  func.func @mlp_kernel(%arg0: i32, %arg1: memref<16x32xf32, #tpu.memory_space<vmem>>, %arg2: memref<32x4xf32, #tpu.memory_space<vmem>>, %arg3: memref<1x4xf32, #tpu.memory_space<vmem>>, %arg4: memref<4x8xf32, #tpu.memory_space<vmem>>, %arg5: memref<1x8xf32, #tpu.memory_space<vmem>>, %arg6: memref<16x8xf32, #tpu.memory_space<vmem>>) attributes {dimension_semantics = [#tpu.dimension_semantics<parallel>], iteration_bounds = array<i64: 1>, scalar_prefetch = 0 : i64, scratch_operands = 0 : i64, tpu.core_type = #tpu.core_type<tc>, window_params = [{transform_indices = @transform_0, window_bounds = array<i64: 16, 32>}, {pipeline_mode = #tpu.pipeline_mode<synchronous>, transform_indices = @transform_1, window_bounds = array<i64: 32, 4>}, {pipeline_mode = #tpu.pipeline_mode<synchronous>, transform_indices = @transform_2, window_bounds = array<i64: 1, 4>}, {pipeline_mode = #tpu.pipeline_mode<synchronous>, transform_indices = @transform_3, window_bounds = array<i64: 4, 8>}, {pipeline_mode = #tpu.pipeline_mode<synchronous>, transform_indices = @transform_4, window_bounds = array<i64: 1, 8>}, {transform_indices = @transform_5, window_bounds = array<i64: 16, 8>}]} {
    %c0 = arith.constant 0 : index
    %c0_0 = arith.constant 0 : index
    %0 = vector.load %arg1[%c0, %c0_0] : memref<16x32xf32, #tpu.memory_space<vmem>>, vector<16x32xf32>
    %c0_1 = arith.constant 0 : index
    %c0_2 = arith.constant 0 : index
    %1 = vector.load %arg2[%c0_1, %c0_2] : memref<32x4xf32, #tpu.memory_space<vmem>>, vector<32x4xf32>
    %cst = arith.constant dense<0.000000e+00> : vector<16x4xf32>
    %2 = tpu.matmul %0, %1, %cst {dimension_numbers = #tpu.dot_dimension_numbers<[1], [0], [0], [1], [0, 0, 1, 1], [], []>} : vector<16x32xf32>, vector<32x4xf32>, vector<16x4xf32> -> vector<16x4xf32>
    %c0_3 = arith.constant 0 : index
    %c0_4 = arith.constant 0 : index
    %3 = vector.load %arg3[%c0_3, %c0_4] : memref<1x4xf32, #tpu.memory_space<vmem>>, vector<1x4xf32>
    %4 = vector.broadcast %3 : vector<1x4xf32> to vector<16x4xf32>
    %5 = arith.addf %2, %4 : vector<16x4xf32>
    %cst_5 = arith.constant 0.000000e+00 : f32
    %6 = vector.broadcast %cst_5 : f32 to vector<16x4xf32>
    %7 = arith.maximumf %5, %6 : vector<16x4xf32>
    %c0_6 = arith.constant 0 : index
    %c0_7 = arith.constant 0 : index
    %8 = vector.load %arg4[%c0_6, %c0_7] : memref<4x8xf32, #tpu.memory_space<vmem>>, vector<4x8xf32>
    %cst_8 = arith.constant dense<0.000000e+00> : vector<16x8xf32>
    %9 = tpu.matmul %7, %8, %cst_8 {dimension_numbers = #tpu.dot_dimension_numbers<[1], [0], [0], [1], [0, 0, 1, 1], [], []>} : vector<16x4xf32>, vector<4x8xf32>, vector<16x8xf32> -> vector<16x8xf32>
    %c0_9 = arith.constant 0 : index
    %c0_10 = arith.constant 0 : index
    %10 = vector.load %arg5[%c0_9, %c0_10] : memref<1x8xf32, #tpu.memory_space<vmem>>, vector<1x8xf32>
    %11 = vector.broadcast %10 : vector<1x8xf32> to vector<16x8xf32>
    %12 = arith.addf %9, %11 : vector<16x8xf32>
    %c0_11 = arith.constant 0 : index
    %c0_12 = arith.constant 0 : index
    %13 = vector.load %arg6[%c0_11, %c0_12] : memref<16x8xf32, #tpu.memory_space<vmem>>, vector<16x8xf32>
    tpu.vector_store %arg6[%c0_11, %c0_12], %12 {strides = array<i32>} : memref<16x8xf32, #tpu.memory_space<vmem>>, vector<16x8xf32>,
    return
  }
  func.func @transform_0(%arg0: i32) -> (i32, i32) {
    %c0_i32 = arith.constant 0 : i32
    %c0_i32_0 = arith.constant 0 : i32
    return %arg0, %c0_i32 : i32, i32
  }
  func.func @transform_1(%arg0: i32) -> (i32, i32) {
    %c0_i32 = arith.constant 0 : i32
    %c0_i32_0 = arith.constant 0 : i32
    %c0_i32_1 = arith.constant 0 : i32
    return %c0_i32, %c0_i32_0 : i32, i32
  }
  func.func @transform_2(%arg0: i32) -> (i32, i32) {
    %c0_i32 = arith.constant 0 : i32
    %c0_i32_0 = arith.constant 0 : i32
    %c0_i32_1 = arith.constant 0 : i32
    return %c0_i32, %c0_i32_0 : i32, i32
  }
  func.func @transform_3(%arg0: i32) -> (i32, i32) {
    %c0_i32 = arith.constant 0 : i32
    %c0_i32_0 = arith.constant 0 : i32
    %c0_i32_1 = arith.constant 0 : i32
    return %c0_i32, %c0_i32_0 : i32, i32
  }
  func.func @transform_4(%arg0: i32) -> (i32, i32) {
    %c0_i32 = arith.constant 0 : i32
    %c0_i32_0 = arith.constant 0 : i32
    %c0_i32_1 = arith.constant 0 : i32
    return %c0_i32, %c0_i32_0 : i32, i32
  }
  func.func @transform_5(%arg0: i32) -> (i32, i32) {
    %c0_i32 = arith.constant 0 : i32
    %c0_i32_0 = arith.constant 0 : i32
    return %arg0, %c0_i32 : i32, i32
  }
}

</mosaic_0001>

<bundles_post_ra>
// kernel: tpu_custom_call.1
= control target key start
LH: loop header
LB: loop body
LE: loop exit
PB: predicated region body
PF: predicated region fallthrough
CT: control target
= control target key end

     0   :  { %vm33_vm0 = vcmask 261120   ;;  %vm132_vm1 = vcmask 1043456   ;;  %vm125_vm2 = vcmask 31744   ;;  %vm211_vm3 = vcmask 64512   ;;  %s321_s1 = inlined_call_operand.vmem [shape: f32[32,4], index: 1, kind: input, shape index: {}]   ;;  %s322_s0 = inlined_call_operand.vmem [shape: f32[16,32], index: 0, kind: input, shape index: {}]   ;;  %s323_s3 = inlined_call_operand.vmem [shape: f32[4,8], index: 3, kind: input, shape index: {}]   ;;  %s324_s2 = inlined_call_operand.vmem [shape: f32[1,4], index: 2, kind: input, shape index: {}]   ;;  %s325_s4 = inlined_call_operand.vmem [shape: f32[1,8], index: 4, kind: input, shape index: {}]   ;;  %s326_s5 = inlined_call_operand.vmem [shape: f32[16,8], index: 5, kind: output, shape index: {}]  }
   0x1   :  { %v22_v0 = vld [vmem:[%s321_s1] sm:$0xff]  ;;  %v23_v1 = vld [vmem:[%s321_s1 + $0x8] sm:$0xff]  ;;  %v24_v2 = vld [vmem:[%s321_s1 + $0x10] sm:$0xff] }
   0x2   :  { %v250_v3 = vpack.c.bf16 %v23_v1, %v22_v0  ;;  %v25_v4 = vld [vmem:[%s321_s1 + $0x18] sm:$0xff]  ;;  %v20_v5 = vld [vmem:[%s322_s0] sm:$0xff]  ;;  %v21_v7 = vld [vmem:[%s322_s0 + $0x8] sm:$0xff] }
   0x3   :  { %v254_v6 = vpack.c.bf16 %v25_v4, %v24_v2  ;;  %242 = vmatprep.mubr.msk.f32.mxu0 %vm33_vm0, %v20_v5  ;;  %v117_v8 = vld [vmem:[%s323_s3] sm:$0xf] }
   0x4   :  { %251 = vmatprep.subr.bf16.mxu0 %v250_v3  ;;  %245 = vmatprep.subr.msk.mxu1 %vm132_vm1, %v117_v8  ;;  %v218_v9 = vld [vmem:[%s324_s2] ss:$0 sm:$0xff] }
   0x5   :  { %253 = vmatpush3.bf16.msra.mxu0 %v250_v3  ;;  %246 = vmatpush3.msk.msra.mxu1 %vm132_vm1, %v117_v8  ;;  %v221_v16 = vld [vmem:[%s325_s4] ss:$0 sm:$0xff] }
   0x6   :  { %255 = vmatprep.subr.bf16.mxu0 %v254_v6 }
   0x9   :  { %257 = vmatpush3.bf16.msra.mxu0 %v254_v6 }
   0xc   :  { %243 = vmatmul.mubr.msk.f32.vlgmr.msra.gmra.mrb[0].mxu0 %vm33_vm0, %v21_v7 }
  0xdf   :  { %v244_v10 = vpop.f32.mrb[0].mxu0 }
  0xe0   :  { %v112_v11 = vadd.f32 %v244_v10, %v218_v9  ;;  %v106_v12 = vpop.f32.mrb[1].mxu0 }
  0xe1   :  { %v107_v13 = vadd.f32 %v218_v9, %v106_v12 }
  0xe2   :  { %v116_v15 = vmax.f32 %v112_v11, 0.0 }
  0xe3   :  { %v115_v14 = vmax.f32 %v107_v13, 0.0 }
  0xe5   :  { %247 = vmatprep.mubr.msk.f32.mxu1 %vm125_vm2, %v115_v14 }
  0xe6   :  { %248 = vmatmul.mubr.msk.f32.vlgmr.msra.gmra.mrb[0].mxu1 %vm125_vm2, %v116_v15 }
 0x1b9   :  { %v249_v17 = vpop.f32.mrb[0].mxu1 }
 0x1ba   :  { %v208_v18 = vadd.f32 %v249_v17, %v221_v16  ;;  %v202_v19 = vpop.f32.mrb[1].mxu1 }
 0x1bb   :  { %v203_v20 = vadd.f32 %v221_v16, %v202_v19 }
 0x1bc   :  { %213 = vst.msk [vmem:[%s326_s5 + $0x8] sm:$0xff] %vm211_vm3, %v208_v18 }
 0x1bd   :  { %212 = vst.msk [vmem:[%s326_s5] sm:$0xff] %vm211_vm3, %v203_v20 }

</bundles_post_ra>
